<compile_context>
chip_gen: v7x
topology: tpu7x:2x2x1
jax: 0.10.0
libtpu: 0.0.40
codegen_flags: <defaults>
</compile_context>

<pallas_src>
import jax
import jax.numpy as jnp
from jax import lax
from jax.experimental import pallas as pl
from jax.experimental.pallas import tpu as pltpu

EPS = 1e-5  # torch.nn.BatchNorm1d default eps


def rnn_bn_linear_kernel(x_ref, h0_ref, wih_ref, whh_ref, brnn_ref,
                         gamma_ref, beta_ref, wout_ref, bout_ref,
                         out_ref, hn_ref):
    """x_ref: (T*B, I) t-major rows   h0_ref: (B, H)
       wih_ref: (I, H)  whh_ref: (H, H)  brnn_ref: (1, H) (= b_ih + b_hh)
       gamma/beta: (1, H)  wout_ref: (H, O)  bout_ref: (1, O)
       out_ref: (T*B, O) t-major rows   hn_ref: (B, H)"""
    TB = x_ref.shape[0]
    B, H = h0_ref.shape
    T = TB // B

    # ---- hoisted input projection: one batched MXU pass, kept in vregs.
    xp = jnp.dot(x_ref[...], wih_ref[...],
                 preferred_element_type=jnp.float32) + brnn_ref[...]  # (T*B,H)

    # ---- recurrence: h_t = tanh(xp_t + h_{t-1} @ W_hh^T), fully unrolled.
    whh = whh_ref[...]
    h = h0_ref[...]
    hs = []                               # per-step hidden states (vreg values)
    s1 = jnp.zeros((B, H), jnp.float32)   # online BN stats: sum(h_t)
    s2 = jnp.zeros((B, H), jnp.float32)   #                  sum(h_t^2)
    for t in range(T):                    # static unroll (T is compile-time)
        pre = xp[t * B:(t + 1) * B, :] + jnp.dot(
            h, whh, preferred_element_type=jnp.float32)
        h = jnp.tanh(pre)
        hs.append(h)
        s1 = s1 + h
        s2 = s2 + h * h
    hn_ref[...] = h

    # ---- BatchNorm1d (training-mode, biased var) folded into output Linear.
    n = float(TB)
    mean = jnp.sum(s1, axis=0, keepdims=True) / n                    # (1, H)
    # var = E[h^2] - E[h]^2; tanh bounds h in [-1,1] so cancellation is benign.
    var = jnp.maximum(jnp.sum(s2, axis=0, keepdims=True) / n - mean * mean,
                      0.0)
    scale = gamma_ref[...] * lax.rsqrt(var + EPS)                    # (1, H)
    wout = wout_ref[...]
    bias_eff = bout_ref[...] + jnp.dot(beta_ref[...] - mean * scale, wout,
                                       preferred_element_type=jnp.float32)

    # ---- time-distributed Linear: one 2D matmul over the whole (T*B, H) slab.
    hs_all = jnp.concatenate(hs, axis=0)                             # (T*B, H)
    out_ref[...] = jnp.dot(hs_all * scale, wout,
                           preferred_element_type=jnp.float32) + bias_eff


def init_params(key, input_size=5, hidden_size=20, output_size=5):
    ks = jax.random.split(key, 6)
    s = 1.0 / jnp.sqrt(jnp.float32(hidden_size))
    u = lambda k, shape: jax.random.uniform(k, shape, jnp.float32, -s, s)
    return dict(
        w_ih=u(ks[0], (hidden_size, input_size)),   # torch RNN weight_ih_l0
        w_hh=u(ks[1], (hidden_size, hidden_size)),  # torch RNN weight_hh_l0
        b_ih=u(ks[2], (hidden_size,)),
        b_hh=u(ks[3], (hidden_size,)),
        gamma=jnp.ones((hidden_size,), jnp.float32),   # BN weight
        beta=jnp.zeros((hidden_size,), jnp.float32),   # BN bias
        w_out=u(ks[4], (output_size, hidden_size)),    # Linear weight
        b_out=u(ks[5], (output_size,)),
    )


def rnn_forward(x, params, h_0=None):
    """x: (B, T, input_size) batch-first, like the PyTorch module.
       Returns (out (B,T,output_size), h_n (1,B,hidden_size))."""
    B, T, I = x.shape
    H = params["w_hh"].shape[0]
    O = params["w_out"].shape[0]

    h0 = (jnp.zeros((B, H), jnp.float32) if h_0 is None
          else jnp.asarray(h_0, jnp.float32).reshape(B, H))

    wih_t = params["w_ih"].T                                   # (I, H)
    whh_t = params["w_hh"].T                                   # (H, H)
    b_rnn = (params["b_ih"] + params["b_hh"]).reshape(1, H)
    gamma = params["gamma"].reshape(1, H)
    beta = params["beta"].reshape(1, H)
    w_out = params["w_out"].T                                  # (H, O)
    b_out = params["b_out"].reshape(1, O)

    # t-major flattening (row index = t*B + b): the per-step slice inside the
    # kernel is a contiguous leading-axis (B, H) block and both big matmuls /
    # the output store become plain 2D slabs. (Tiny XLA transpose, fused under
    # jit; x keeps its native dtype.)
    x_tb = jnp.swapaxes(x, 0, 1).reshape(T * B, I)

    itemsize = 4
    flops = 2 * B * T * (I * H + H * H + H * O)
    transcendentals = B * T * H  # tanh
    bytes_accessed = itemsize * (T * B * I + B * H + I * H + H * H
                                 + 5 * H + H * O + 2 * O
                                 + T * B * O + B * H)

    vmem = pl.BlockSpec(memory_space=pltpu.MemorySpace.VMEM)
    out2d, h_n = pl.pallas_call(
        rnn_bn_linear_kernel,
        out_shape=(jax.ShapeDtypeStruct((T * B, O), jnp.float32),
                   jax.ShapeDtypeStruct((B, H), jnp.float32)),
        in_specs=[vmem] * 9,
        out_specs=(vmem, vmem),
        cost_estimate=pl.CostEstimate(flops=flops,
                                      transcendentals=transcendentals,
                                      bytes_accessed=bytes_accessed),
    )(x_tb, h0, wih_t, whh_t, b_rnn, gamma, beta, w_out, b_out)

    out = jnp.swapaxes(out2d.reshape(T, B, O), 0, 1)           # (B, T, O)
    return out, h_n[None]                                      # (1, B, H)


def rnn_forward_ref(x, params, h_0=None):
    """Pure-JAX reference mirroring the PyTorch forward (training-mode BN)."""
    B, T, I = x.shape
    H = params["w_hh"].shape[0]
    h = jnp.zeros((B, H), jnp.float32) if h_0 is None else h_0.reshape(B, H)
    hs = []
    for t in range(T):
        h = jnp.tanh(x[:, t, :] @ params["w_ih"].T + params["b_ih"]
                     + h @ params["w_hh"].T + params["b_hh"])
        hs.append(h)
    rnn_out = jnp.stack(hs, axis=1)                              # (B, T, H)
    mean = jnp.mean(rnn_out, axis=(0, 1))
    var = jnp.mean((rnn_out - mean) ** 2, axis=(0, 1))
    bn = (rnn_out - mean) / jnp.sqrt(var + EPS) * params["gamma"] + params["beta"]
    out = bn @ params["w_out"].T + params["b_out"]               # (B, T, O)
    return out, h[None]


if __name__ == "__main__":
    key = jax.random.PRNGKey(0)
    k_x, k_p = jax.random.split(key)

    B, T, I, H, O = 2, 8, 5, 20, 5
    x = jax.random.normal(k_x, (B, T, I), jnp.float32)
    params = init_params(k_p, input_size=I, hidden_size=H, output_size=O)

    fwd = jax.jit(rnn_forward)
    out, h_n = fwd(x, params)
    out, h_n = jax.block_until_ready((out, h_n))

    out_ref, h_n_ref = rnn_forward_ref(x, params, h_0=None)
    assert out.shape == (B, T, O) and h_n.shape == (1, B, H)
    assert jnp.allclose(out, out_ref, rtol=1e-3, atol=2e-3)
    assert jnp.allclose(h_n, h_n_ref, rtol=1e-3, atol=2e-3)

    print("KERNEL_OK")
</pallas_src>

<mosaic_0001>
module attributes {stable_mosaic.version = 11 : i64} {
  func.func @rnn_bn_linear_kernel(%arg0: memref<16x5xf32, #tpu.memory_space<vmem>>, %arg1: memref<2x20xf32, #tpu.memory_space<vmem>>, %arg2: memref<5x20xf32, #tpu.memory_space<vmem>>, %arg3: memref<20x20xf32, #tpu.memory_space<vmem>>, %arg4: memref<1x20xf32, #tpu.memory_space<vmem>>, %arg5: memref<1x20xf32, #tpu.memory_space<vmem>>, %arg6: memref<1x20xf32, #tpu.memory_space<vmem>>, %arg7: memref<20x5xf32, #tpu.memory_space<vmem>>, %arg8: memref<1x5xf32, #tpu.memory_space<vmem>>, %arg9: memref<16x5xf32, #tpu.memory_space<vmem>>, %arg10: memref<2x20xf32, #tpu.memory_space<vmem>>) attributes {dimension_semantics = [], scalar_prefetch = 0 : i64, scratch_operands = 0 : i64, tpu.core_type = #tpu.core_type<tc>} {
    %c0 = arith.constant 0 : index
    %c0_0 = arith.constant 0 : index
    %0 = vector.load %arg0[%c0, %c0_0] : memref<16x5xf32, #tpu.memory_space<vmem>>, vector<16x5xf32>
    %c0_1 = arith.constant 0 : index
    %c0_2 = arith.constant 0 : index
    %1 = vector.load %arg2[%c0_1, %c0_2] : memref<5x20xf32, #tpu.memory_space<vmem>>, vector<5x20xf32>
    %cst = arith.constant dense<0.000000e+00> : vector<16x20xf32>
    %2 = tpu.matmul %0, %1, %cst {dimension_numbers = #tpu.dot_dimension_numbers<[1], [0], [0], [1], [0, 0, 1, 1], [], []>} : vector<16x5xf32>, vector<5x20xf32>, vector<16x20xf32> -> vector<16x20xf32>
    %c0_3 = arith.constant 0 : index
    %c0_4 = arith.constant 0 : index
    %3 = vector.load %arg4[%c0_3, %c0_4] : memref<1x20xf32, #tpu.memory_space<vmem>>, vector<1x20xf32>
    %4 = vector.broadcast %3 : vector<1x20xf32> to vector<16x20xf32>
    %5 = arith.addf %2, %4 : vector<16x20xf32>
    %c0_5 = arith.constant 0 : index
    %c0_6 = arith.constant 0 : index
    %6 = vector.load %arg3[%c0_5, %c0_6] : memref<20x20xf32, #tpu.memory_space<vmem>>, vector<20x20xf32>
    %c0_7 = arith.constant 0 : index
    %c0_8 = arith.constant 0 : index
    %7 = vector.load %arg1[%c0_7, %c0_8] : memref<2x20xf32, #tpu.memory_space<vmem>>, vector<2x20xf32>
    %cst_9 = arith.constant 0.000000e+00 : f32
    %8 = vector.broadcast %cst_9 : f32 to vector<2x20xf32>
    %cst_10 = arith.constant 0.000000e+00 : f32
    %9 = vector.broadcast %cst_10 : f32 to vector<2x20xf32>
    %10 = vector.extract_strided_slice %5 {offsets = [0, 0], sizes = [2, 20], strides = [1, 1]} : vector<16x20xf32> to vector<2x20xf32>
    %cst_11 = arith.constant dense<0.000000e+00> : vector<2x20xf32>
    %11 = tpu.matmul %7, %6, %cst_11 {dimension_numbers = #tpu.dot_dimension_numbers<[1], [0], [0], [1], [0, 0, 1, 1], [], []>} : vector<2x20xf32>, vector<20x20xf32>, vector<2x20xf32> -> vector<2x20xf32>
    %12 = arith.addf %10, %11 : vector<2x20xf32>
    %13 = math.tanh %12 : vector<2x20xf32>
    %14 = arith.addf %8, %13 : vector<2x20xf32>
    %15 = arith.mulf %13, %13 : vector<2x20xf32>
    %16 = arith.addf %9, %15 : vector<2x20xf32>
    %17 = vector.extract_strided_slice %5 {offsets = [2, 0], sizes = [2, 20], strides = [1, 1]} : vector<16x20xf32> to vector<2x20xf32>
    %cst_12 = arith.constant dense<0.000000e+00> : vector<2x20xf32>
    %18 = tpu.matmul %13, %6, %cst_12 {dimension_numbers = #tpu.dot_dimension_numbers<[1], [0], [0], [1], [0, 0, 1, 1], [], []>} : vector<2x20xf32>, vector<20x20xf32>, vector<2x20xf32> -> vector<2x20xf32>
    %19 = arith.addf %17, %18 : vector<2x20xf32>
    %20 = math.tanh %19 : vector<2x20xf32>
    %21 = arith.addf %14, %20 : vector<2x20xf32>
    %22 = arith.mulf %20, %20 : vector<2x20xf32>
    %23 = arith.addf %16, %22 : vector<2x20xf32>
    %24 = vector.extract_strided_slice %5 {offsets = [4, 0], sizes = [2, 20], strides = [1, 1]} : vector<16x20xf32> to vector<2x20xf32>
    %cst_13 = arith.constant dense<0.000000e+00> : vector<2x20xf32>
    %25 = tpu.matmul %20, %6, %cst_13 {dimension_numbers = #tpu.dot_dimension_numbers<[1], [0], [0], [1], [0, 0, 1, 1], [], []>} : vector<2x20xf32>, vector<20x20xf32>, vector<2x20xf32> -> vector<2x20xf32>
    %26 = arith.addf %24, %25 : vector<2x20xf32>
    %27 = math.tanh %26 : vector<2x20xf32>
    %28 = arith.addf %21, %27 : vector<2x20xf32>
    %29 = arith.mulf %27, %27 : vector<2x20xf32>
    %30 = arith.addf %23, %29 : vector<2x20xf32>
    %31 = vector.extract_strided_slice %5 {offsets = [6, 0], sizes = [2, 20], strides = [1, 1]} : vector<16x20xf32> to vector<2x20xf32>
    %cst_14 = arith.constant dense<0.000000e+00> : vector<2x20xf32>
    %32 = tpu.matmul %27, %6, %cst_14 {dimension_numbers = #tpu.dot_dimension_numbers<[1], [0], [0], [1], [0, 0, 1, 1], [], []>} : vector<2x20xf32>, vector<20x20xf32>, vector<2x20xf32> -> vector<2x20xf32>
    %33 = arith.addf %31, %32 : vector<2x20xf32>
    %34 = math.tanh %33 : vector<2x20xf32>
    %35 = arith.addf %28, %34 : vector<2x20xf32>
    %36 = arith.mulf %34, %34 : vector<2x20xf32>
    %37 = arith.addf %30, %36 : vector<2x20xf32>
    %38 = vector.extract_strided_slice %5 {offsets = [8, 0], sizes = [2, 20], strides = [1, 1]} : vector<16x20xf32> to vector<2x20xf32>
    %cst_15 = arith.constant dense<0.000000e+00> : vector<2x20xf32>
    %39 = tpu.matmul %34, %6, %cst_15 {dimension_numbers = #tpu.dot_dimension_numbers<[1], [0], [0], [1], [0, 0, 1, 1], [], []>} : vector<2x20xf32>, vector<20x20xf32>, vector<2x20xf32> -> vector<2x20xf32>
    %40 = arith.addf %38, %39 : vector<2x20xf32>
    %41 = math.tanh %40 : vector<2x20xf32>
    %42 = arith.addf %35, %41 : vector<2x20xf32>
    %43 = arith.mulf %41, %41 : vector<2x20xf32>
    %44 = arith.addf %37, %43 : vector<2x20xf32>
    %45 = vector.extract_strided_slice %5 {offsets = [10, 0], sizes = [2, 20], strides = [1, 1]} : vector<16x20xf32> to vector<2x20xf32>
    %cst_16 = arith.constant dense<0.000000e+00> : vector<2x20xf32>
    %46 = tpu.matmul %41, %6, %cst_16 {dimension_numbers = #tpu.dot_dimension_numbers<[1], [0], [0], [1], [0, 0, 1, 1], [], []>} : vector<2x20xf32>, vector<20x20xf32>, vector<2x20xf32> -> vector<2x20xf32>
    %47 = arith.addf %45, %46 : vector<2x20xf32>
    %48 = math.tanh %47 : vector<2x20xf32>
    %49 = arith.addf %42, %48 : vector<2x20xf32>
    %50 = arith.mulf %48, %48 : vector<2x20xf32>
    %51 = arith.addf %44, %50 : vector<2x20xf32>
    %52 = vector.extract_strided_slice %5 {offsets = [12, 0], sizes = [2, 20], strides = [1, 1]} : vector<16x20xf32> to vector<2x20xf32>
    %cst_17 = arith.constant dense<0.000000e+00> : vector<2x20xf32>
    %53 = tpu.matmul %48, %6, %cst_17 {dimension_numbers = #tpu.dot_dimension_numbers<[1], [0], [0], [1], [0, 0, 1, 1], [], []>} : vector<2x20xf32>, vector<20x20xf32>, vector<2x20xf32> -> vector<2x20xf32>
    %54 = arith.addf %52, %53 : vector<2x20xf32>
    %55 = math.tanh %54 : vector<2x20xf32>
    %56 = arith.addf %49, %55 : vector<2x20xf32>
    %57 = arith.mulf %55, %55 : vector<2x20xf32>
    %58 = arith.addf %51, %57 : vector<2x20xf32>
    %59 = vector.extract_strided_slice %5 {offsets = [14, 0], sizes = [2, 20], strides = [1, 1]} : vector<16x20xf32> to vector<2x20xf32>
    %cst_18 = arith.constant dense<0.000000e+00> : vector<2x20xf32>
    %60 = tpu.matmul %55, %6, %cst_18 {dimension_numbers = #tpu.dot_dimension_numbers<[1], [0], [0], [1], [0, 0, 1, 1], [], []>} : vector<2x20xf32>, vector<20x20xf32>, vector<2x20xf32> -> vector<2x20xf32>
    %61 = arith.addf %59, %60 : vector<2x20xf32>
    %62 = math.tanh %61 : vector<2x20xf32>
    %63 = arith.addf %56, %62 : vector<2x20xf32>
    %64 = arith.mulf %62, %62 : vector<2x20xf32>
    %65 = arith.addf %58, %64 : vector<2x20xf32>
    %c0_19 = arith.constant 0 : index
    %c0_20 = arith.constant 0 : index
    %66 = vector.load %arg10[%c0_19, %c0_20] : memref<2x20xf32, #tpu.memory_space<vmem>>, vector<2x20xf32>
    tpu.vector_store %arg10[%c0_19, %c0_20], %62 {strides = array<i32>} : memref<2x20xf32, #tpu.memory_space<vmem>>, vector<2x20xf32>,
    %cst_21 = arith.constant dense<0.000000e+00> : vector<20xf32>
    %67 = vector.multi_reduction <add>, %63, %cst_21 [0] : vector<2x20xf32> to vector<20xf32>
    %68 = vector.shape_cast %67 : vector<20xf32> to vector<1x20xf32>
    %cst_22 = arith.constant 1.600000e+01 : f32
    %69 = vector.broadcast %cst_22 : f32 to vector<1x20xf32>
    %70 = arith.divf %68, %69 : vector<1x20xf32>
    %cst_23 = arith.constant dense<0.000000e+00> : vector<20xf32>
    %71 = vector.multi_reduction <add>, %65, %cst_23 [0] : vector<2x20xf32> to vector<20xf32>
    %72 = vector.shape_cast %71 : vector<20xf32> to vector<1x20xf32>
    %cst_24 = arith.constant 1.600000e+01 : f32
    %73 = vector.broadcast %cst_24 : f32 to vector<1x20xf32>
    %74 = arith.divf %72, %73 : vector<1x20xf32>
    %75 = arith.mulf %70, %70 : vector<1x20xf32>
    %76 = arith.subf %74, %75 : vector<1x20xf32>
    %cst_25 = arith.constant 0.000000e+00 : f32
    %77 = vector.broadcast %cst_25 : f32 to vector<1x20xf32>
    %78 = arith.maximumf %76, %77 : vector<1x20xf32>
    %c0_26 = arith.constant 0 : index
    %c0_27 = arith.constant 0 : index
    %79 = vector.load %arg5[%c0_26, %c0_27] : memref<1x20xf32, #tpu.memory_space<vmem>>, vector<1x20xf32>
    %cst_28 = arith.constant 9.99999974E-6 : f32
    %80 = vector.broadcast %cst_28 : f32 to vector<1x20xf32>
    %81 = arith.addf %78, %80 : vector<1x20xf32>
    %82 = math.rsqrt %81 : vector<1x20xf32>
    %83 = arith.mulf %79, %82 : vector<1x20xf32>
    %c0_29 = arith.constant 0 : index
    %c0_30 = arith.constant 0 : index
    %84 = vector.load %arg7[%c0_29, %c0_30] : memref<20x5xf32, #tpu.memory_space<vmem>>, vector<20x5xf32>
    %c0_31 = arith.constant 0 : index
    %c0_32 = arith.constant 0 : index
    %85 = vector.load %arg8[%c0_31, %c0_32] : memref<1x5xf32, #tpu.memory_space<vmem>>, vector<1x5xf32>
    %c0_33 = arith.constant 0 : index
    %c0_34 = arith.constant 0 : index
    %86 = vector.load %arg6[%c0_33, %c0_34] : memref<1x20xf32, #tpu.memory_space<vmem>>, vector<1x20xf32>
    %87 = arith.mulf %70, %83 : vector<1x20xf32>
    %88 = arith.subf %86, %87 : vector<1x20xf32>
    %cst_35 = arith.constant dense<0.000000e+00> : vector<1x5xf32>
    %89 = tpu.matmul %88, %84, %cst_35 {dimension_numbers = #tpu.dot_dimension_numbers<[1], [0], [0], [1], [0, 0, 1, 1], [], []>} : vector<1x20xf32>, vector<20x5xf32>, vector<1x5xf32> -> vector<1x5xf32>
    %90 = arith.addf %85, %89 : vector<1x5xf32>
    %91 = tpu.concatenate %13, %20, %27, %34, %41, %48, %55, %62 in 0 : vector<2x20xf32>, vector<2x20xf32>, vector<2x20xf32>, vector<2x20xf32>, vector<2x20xf32>, vector<2x20xf32>, vector<2x20xf32>, vector<2x20xf32> -> vector<16x20xf32>
    %92 = vector.broadcast %83 : vector<1x20xf32> to vector<16x20xf32>
    %93 = arith.mulf %91, %92 : vector<16x20xf32>
    %cst_36 = arith.constant dense<0.000000e+00> : vector<16x5xf32>
    %94 = tpu.matmul %93, %84, %cst_36 {dimension_numbers = #tpu.dot_dimension_numbers<[1], [0], [0], [1], [0, 0, 1, 1], [], []>} : vector<16x20xf32>, vector<20x5xf32>, vector<16x5xf32> -> vector<16x5xf32>
    %95 = vector.broadcast %90 : vector<1x5xf32> to vector<16x5xf32>
    %96 = arith.addf %94, %95 : vector<16x5xf32>
    %c0_37 = arith.constant 0 : index
    %c0_38 = arith.constant 0 : index
    %97 = vector.load %arg9[%c0_37, %c0_38] : memref<16x5xf32, #tpu.memory_space<vmem>>, vector<16x5xf32>
    tpu.vector_store %arg9[%c0_37, %c0_38], %96 {strides = array<i32>} : memref<16x5xf32, #tpu.memory_space<vmem>>, vector<16x5xf32>,
    return
  }
}

</mosaic_0001>

<bundles_post_ra>
// kernel: rnn_forward.1
= control target key start
LH: loop header
LB: loop body
LE: loop exit
PB: predicated region body
PF: predicated region fallthrough
CT: control target
= control target key end

     0   :  { %vm52_vm0 = vcmask 1044480   ;;  %vm45_vm1 = vcmask 39936   ;;  %v1288_v2 = vmov 0.0|0.0   ;;  %vm1289_vm2 = vmmov 0   ;;  %s1504_s0 = inlined_call_operand.vmem [shape: f32[16,5], index: 0, kind: input, shape index: {}]   ;;  %s1505_s1 = inlined_call_operand.vmem [shape: f32[2,20], index: 1, kind: input, shape index: {}]   ;;  %s1506_s2 = inlined_call_operand.vmem [shape: f32[5,20], index: 2, kind: input, shape index: {}]   ;;  %s1507_s3 = inlined_call_operand.vmem [shape: f32[20,20], index: 3, kind: input, shape index: {}]   ;;  %s1508_s4 = inlined_call_operand.vmem [shape: f32[1,20], index: 4, kind: input, shape index: {}]   ;;  %s1509_s5 = inlined_call_operand.vmem [shape: f32[1,20], index: 5, kind: input, shape index: {}]   ;;  %s1510_s6 = inlined_call_operand.vmem [shape: f32[1,20], index: 6, kind: input, shape index: {}]   ;;  %s1511_s7 = inlined_call_operand.vmem [shape: f32[20,5], index: 7, kind: input, shape index: {}]   ;;  %s1512_s8 = inlined_call_operand.vmem [shape: f32[1,5], index: 8, kind: input, shape index: {}]   ;;  %s1513_s9 = inlined_call_operand.vmem [shape: f32[16,5], index: 9, kind: output, shape index: {0}]   ;;  %s1514_s10 = inlined_call_operand.hbm [shape: f32[2,20], index: 10, kind: output, shape index: {1}]  }
   0x1   :  { %v37_v0 = vld [vmem:[%s1506_s2] sm:$0x1f]  ;;  %1211 = vmatprep.subr.bf16.mxu1 %v1288_v2  ;;  %v132_v4 = vld [vmem:[%s1507_s3 + $0x8] sm:$0xff]  ;;  %v1290_v7 = vmov 0.0  }
   0x2   :  { %v35_v1 = vld [vmem:[%s1504_s0] sm:$0xff]  ;;  %1116 = vmatprep.subr.msk.mxu0 %vm52_vm0, %v37_v0  ;;  %v36_v5 = vld [vmem:[%s1504_s0 + $0x8] sm:$0xff]  ;;  %1127 = vmatprep.mubr.msk.f32.mxu1 %vm1289_vm2, %v1290_v7 }
   0x3   :  { %v131_v3 = vld [vmem:[%s1507_s3] sm:$0xff]  ;;  %1117 = vmatpush3.msk.msra.mxu0 %vm52_vm0, %v37_v0  ;;  %1118 = vmatprep.mubr.msk.f32.mxu0 %vm45_vm1, %v35_v1 }
   0x4   :  { %v1364_v6 = vpack.c.bf16 %v132_v4, %v131_v3  ;;  %1119 = vmatmul.mubr.msk.f32.vlgmr.msra.gmra.mrb[0].mxu0 %vm45_vm1, %v36_v5 }
   0x5   :  { %16 = vsyncpa [#allocation3], 0  ;;  %1214 = vmatprep.subr.bf16.mxu0 %v1288_v2  ;;  %v1375_v8 = vld [vmem:[%s1507_s3 + $0x10] sm:$0xf]  ;;  %vm139_vm3 = vcmask 1043456   ;;  %vm135_vm4 = vcmask 162816   ;;  %1136 = vmatprep.mubr.msk.f32.mxu0 %vm1289_vm2, %v1290_v7 }
   0x6   :  { %1213 = vmatpush3.bf16.msra.mxu1 %v1364_v6  ;;  %1216 = vmatpush3.bf16.msra.mxu0 %v1364_v6  ;;  %v134_v9 = vld [vmem:[%s1505_s1] sm:$0x3]  ;;  %vm924_vm5 = vcmask 1041408   ;;  %vm927_vm6 = vcmask 1045504   ;;  %vm813_vm7 = vcmask 162822   ;;  %vm815_vm8 = vcmask 156672  }
   0x7   :  { %1125 = vmatprep.subr.mxu1 %v1290_v7  ;;  %1134 = vmatprep.subr.mxu0 %v1290_v7  ;;  %v1047_v10 = vld [vmem:[%s1508_s4] ss:$0 sm:$0xff] }
   0xa   :  { %1126 = vmatpush3.msk.msra.mxu1 %vm139_vm3, %v1375_v8  ;;  %1135 = vmatpush3.msk.msra.mxu0 %vm139_vm3, %v1375_v8 }
   0xb   :  { %1128 = vmatmul.mubr.msk.f32.vlgmr.msra.gmra.mrb[0].mxu1 %vm135_vm4, %v134_v9  ;;  %1217 = vmatprep.subr.bf16.mxu1 %v1288_v2 }
   0xc   :  { %1145 = vmatprep.mubr.msk.f32.mxu1 %vm1289_vm2, %v1290_v7  ;;  %1219 = vmatpush3.bf16.msra.mxu1 %v1364_v6 }
   0xd   :  { %1220 = vmatprep.subr.bf16.mxu0 %v1288_v2  ;;  %1143 = vmatprep.subr.mxu1 %v1290_v7 }
  0x10   :  { %1144 = vmatpush3.msk.msra.mxu1 %vm139_vm3, %v1375_v8 }
  0x11   :  { %1223 = vmatprep.subr.bf16.mxu1 %v1288_v2 }
  0xd7   :  { %v1120_v11 = vpop.f32.mrb[0].mxu0 }
  0xd8   :  { %v1401_v12 = vadd.f32 %v1120_v11, %v1047_v10  ;;  %v122_v13 = vpop.f32.mrb[1].mxu0 }
  0xd9   :  { %v123_v14 = vadd.f32 %v1047_v10, %v122_v13 }
  0xde   :  { %v209_v15 = vpop.f32.mrb[0].mxu1 }
  0xdf   :  { %v213_v16 = vadd.f32 %v209_v15, %v123_v14  ;;  %v1129_v17 = vpop.f32.mrb[1].mxu1 }
  0xe1   :  { %1246 = vtanh.f32 %v213_v16 }
  0xeb   :  { %v1247_v18 = vpop.eup %1246 }
  0xec   :  { %1137 = vmatmul.mubr.msk.f32.vlgmr.msra.gmra.mrb[2].mxu0 %vm135_vm4, %v1247_v18  ;;  %v216_v32 = vmul.f32 %v1247_v18, %v1247_v18 }
  0xed   :  { %1222 = vmatpush3.bf16.msra.mxu0 %v1364_v6  ;;  %1154 = vmatprep.mubr.msk.f32.mxu0 %vm1289_vm2, %v1290_v7 }
  0xee   :  { %1152 = vmatprep.subr.mxu0 %v1290_v7 }
  0xf1   :  { %1153 = vmatpush3.msk.msra.mxu0 %vm139_vm3, %v1375_v8 }
  0xf2   :  { %1226 = vmatprep.subr.bf16.mxu0 %v1288_v2 }
 0x1bf   :  { %v287_v19 = vpop.f32.mrb[2].mxu0 }
 0x1c0   :  { %v292_v20 = vrot.slane %v287_v19, 6  ;;  %v1138_v21 = vpop.f32.mrb[3].mxu0 }
 0x1c1   :  { %v841_v21 = vld [vmem:[%s1511_s7 + $0x8] sm:$0xff] }
 0x1c2   :  { %v294_v22 = vadd.f32 %v292_v20, %v123_v14  ;;  %v840_v20 = vld [vmem:[%s1511_s7] sm:$0xff] }
 0x1c4   :  { %1248 = vtanh.f32 %v294_v22  ;;  %v1236_v22 = vpack.c.bf16 %v841_v21, %v840_v20 }
 0x1ce   :  { %v1249_v23 = vpop.eup %1248 }
 0x1cf   :  { %v297_v24 = vrot.slane %v1249_v23, 2  ;;  %v300_v29 = vmul.f32 %v1249_v23, %v1249_v23  ;;  %v925_v33 = vsel %vm924_vm5, %v1247_v18, %v1249_v23  ;;  %v842_v23 = vld [vmem:[%s1511_s7 + $0x10] sm:$0xf] }
 0x1d1   :  { %1146 = vmatmul.mubr.msk.f32.vlgmr.msra.gmra.mrb[2].mxu1 %vm135_vm4, %v297_v24  ;;  %v302_v30 = vrot.slane %v300_v29, 2  ;;  %v299_v34 = vadd.f32 %v1247_v18, %v297_v24 }
 0x1d2   :  { %1225 = vmatpush3.bf16.msra.mxu1 %v1364_v6  ;;  %1163 = vmatprep.mubr.msk.f32.mxu1 %vm1289_vm2, %v1290_v7 }
 0x1d3   :  { %1161 = vmatprep.subr.mxu1 %v1290_v7  ;;  %v304_v38 = vadd.f32 %v302_v30, %v216_v32 }
 0x1d6   :  { %1162 = vmatpush3.msk.msra.mxu1 %vm139_vm3, %v1375_v8 }
 0x1d7   :  { %1229 = vmatprep.subr.bf16.mxu1 %v1288_v2 }
 0x2a4   :  { %v373_v25 = vpop.f32.mrb[2].mxu1 }
 0x2a5   :  { %v378_v26 = vrot.slane %v373_v25, 4  ;;  %v1147_v27 = vpop.f32.mrb[3].mxu1 }
 0x2a7   :  { %v380_v28 = vadd.f32 %v378_v26, %v123_v14 }
 0x2a9   :  { %1250 = vtanh.f32 %v380_v28 }
 0x2b3   :  { %v1251_v31 = vpop.eup %1250 }
 0x2b4   :  { %v386_v35 = vmul.f32 %v1251_v31, %v1251_v31  ;;  %v383_v36 = vrot.slane %v1251_v31, 4  ;;  %v926_v37 = vsel %vm139_vm3, %v925_v33, %v1251_v31 }
 0x2b6   :  { %v388_v39 = vrot.slane %v386_v35, 4  ;;  %v385_v40 = vadd.f32 %v383_v36, %v299_v34  ;;  %1155 = vmatmul.mubr.msk.f32.vlgmr.msra.gmra.mrb[4].mxu0 %vm135_vm4, %v383_v36 }
 0x2b7   :  { %1228 = vmatpush3.bf16.msra.mxu0 %v1364_v6  ;;  %1172 = vmatprep.mubr.msk.f32.mxu0 %vm1289_vm2, %v1290_v7 }
 0x2b8   :  { %v390_v41 = vadd.f32 %v388_v39, %v304_v38  ;;  %1170 = vmatprep.subr.mxu0 %v1290_v7 }
 0x2bb   :  { %1171 = vmatpush3.msk.msra.mxu0 %vm139_vm3, %v1375_v8 }
 0x2bc   :  { %1232 = vmatprep.subr.bf16.mxu0 %v1288_v2 }
 0x389   :  { %v459_v42 = vpop.f32.mrb[4].mxu0 }
 0x38a   :  { %v464_v43 = vrot.slane %v459_v42, 2  ;;  %v1156_v44 = vpop.f32.mrb[5].mxu0 }
 0x38c   :  { %v466_v45 = vadd.f32 %v464_v43, %v123_v14 }
 0x38e   :  { %1252 = vtanh.f32 %v466_v45 }
 0x398   :  { %v1253_v46 = vpop.eup %1252 }
 0x399   :  { %v472_v47 = vmul.f32 %v1253_v46, %v1253_v46  ;;  %v469_v48 = vrot.slane %v1253_v46, 6  ;;  %v1430_v49 = vsel %vm927_vm6, %v926_v37, %v1253_v46 }
 0x39b   :  { %v474_v50 = vrot.slane %v472_v47, 6  ;;  %v471_v51 = vadd.f32 %v469_v48, %v385_v40  ;;  %1164 = vmatmul.mubr.msk.f32.vlgmr.msra.gmra.mrb[4].mxu1 %vm135_vm4, %v469_v48 }
 0x39c   :  { %1231 = vmatpush3.bf16.msra.mxu1 %v1364_v6  ;;  %1181 = vmatprep.mubr.msk.f32.mxu1 %vm1289_vm2, %v1290_v7 }
 0x39d   :  { %v476_v52 = vadd.f32 %v474_v50, %v390_v41  ;;  %1179 = vmatprep.subr.mxu1 %v1290_v7 }
 0x3a0   :  { %1180 = vmatpush3.msk.msra.mxu1 %vm139_vm3, %v1375_v8 }
 0x3a1   :  { %1235 = vmatprep.subr.bf16.mxu1 %v1288_v2 }
 0x46e   :  { %v545_v53 = vpop.f32.mrb[4].mxu1 }
 0x46f   :  { %v549_v54 = vadd.f32 %v545_v53, %v1401_v12  ;;  %v1165_v55 = vpop.f32.mrb[5].mxu1 }
 0x471   :  { %1254 = vtanh.f32 %v549_v54  ;;  %v933_v54 = vlaneseq }
 0x473   :  { %v934_v55 = vshrl.u32 %v933_v54, 7 }
 0x47b   :  { %v1255_v56 = vpop.eup %1254 }
 0x47c   :  { %1173 = vmatmul.mubr.msk.f32.vlgmr.msra.gmra.mrb[6].mxu0 %vm135_vm4, %v1255_v56  ;;  %v552_v61 = vmul.f32 %v1255_v56, %v1255_v56  ;;  %v551_v0 = vadd.f32 %v1255_v56, %v471_v51 }
 0x47d   :  { %1234 = vmatpush3.bf16.msra.mxu0 %v1364_v6  ;;  %1190 = vmatprep.mubr.msk.f32.mxu0 %vm1289_vm2, %v1290_v7 }
 0x47e   :  { %1188 = vmatprep.subr.mxu0 %v1290_v7  ;;  %v553_v4 = vadd.f32 %v552_v61, %v476_v52 }
 0x481   :  { %1189 = vmatpush3.msk.msra.mxu0 %vm139_vm3, %v1375_v8 }
 0x482   :  { %1239 = vmatprep.subr.bf16.mxu0 %v1236_v22 }
 0x54f   :  { %v623_v57 = vpop.f32.mrb[6].mxu0 }
 0x550   :  { %v628_v58 = vrot.slane %v623_v57, 6  ;;  %v1174_v59 = vpop.f32.mrb[7].mxu0  ;;  %v935_v57 = vsub.s32 0, %v934_v55 }
 0x552   :  { %v630_v60 = vadd.f32 %v628_v58, %v1401_v12 }
 0x554   :  { %1256 = vtanh.f32 %v630_v60  ;;  %v844_v60 = vld [vmem:[%s1510_s6] sm:$0x1] }
 0x55e   :  { %v1257_v62 = vpop.eup %1256 }
 0x55f   :  { %v636_v63 = vmul.f32 %v1257_v62, %v1257_v62  ;;  %v633_v1 = vrot.slane %v1257_v62, 2  ;;  %v929_v13 = vsel %vm924_vm5, %v1255_v56, %v1257_v62  ;;  %v836_v56 = vld [vmem:[%s1509_s5] sm:$0x1]  ;;  %s1291_s5 = smov [#allocation2]  }
 0x560   :  { %s1037_s13 = sshll.u32 %s1291_s5, 4  ;;  %s1038_s13 = int_to_ptr.vmem [resolvable:$true] %s1037_s13 }
 0x561   :  { %v638_v2 = vrot.slane %v636_v63, 2  ;;  %v635_v3 = vadd.f32 %v633_v1, %v551_v0  ;;  %1182 = vmatmul.mubr.msk.f32.vlgmr.msra.gmra.mrb[6].mxu1 %vm135_vm4, %v633_v1  ;;  %s1264_s14 = scalar_lea.vmem %s1038_s13, 32  ;;  %p1269_p1 = scmp.lt.s32.totalorder %s1038_s13, %s1038_s13 }
 0x562   :  { %1199 = vmatprep.mubr.msk.f32.mxu1 %vm1289_vm2, %v1290_v7  ;;  %1237 = vmatpush3.bf16.msra.mxu1 %v1236_v22  ;;  %p1265_p0 = scmp.ne.s32.totalorder %s1038_s13, %s1264_s14  ;;  %p1270_p2 = scmp.lt.s32.totalorder %s1264_s14, %s1264_s14 }
 0x563   :  { %v640_v5 = vadd.f32 %v638_v2, %v553_v4  ;;  %1197 = vmatprep.subr.mxu1 %v1290_v7 }
 0x564   :  { %p1271_p3 = por %p1270_p2, %p1269_p1 }
 0x566   :  { %1198 = vmatpush3.msk.msra.mxu1 %vm139_vm3, %v842_v23  ;;  %p1272_p4 = pnand %p1271_p3, %p1265_p0 }
 0x634   :  { %v709_v6 = vpop.f32.mrb[6].mxu1 }
 0x635   :  { %v714_v8 = vrot.slane %v709_v6, 4  ;;  %v1183_v9 = vpop.f32.mrb[7].mxu1 }
 0x637   :  { %v716_v10 = vadd.f32 %v714_v8, %v1401_v12 }
 0x639   :  { %1258 = vtanh.f32 %v716_v10 }
 0x643   :  { %v1259_v11 = vpop.eup %1258 }
 0x644   :  { %v722_v14 = vmul.f32 %v1259_v11, %v1259_v11  ;;  %v719_v15 = vrot.slane %v1259_v11, 4  ;;  %v930_v16 = vsel %vm139_vm3, %v929_v13, %v1259_v11 }
 0x646   :  { %v724_v17 = vrot.slane %v722_v14, 4  ;;  %v721_v18 = vadd.f32 %v719_v15, %v635_v3  ;;  %1191 = vmatmul.mubr.msk.f32.vlgmr.msra.gmra.mrb[8].mxu0 %vm135_vm4, %v719_v15 }
 0x647   :  { %1241 = vmatpush3.bf16.msra.mxu0 %v1236_v22 }
 0x648   :  { %v726_v19 = vadd.f32 %v724_v17, %v640_v5  ;;  %1206 = vmatprep.subr.msk.mxu0 %vm139_vm3, %v842_v23 }
 0x64b   :  { %1207 = vmatpush3.msk.msra.mxu0 %vm139_vm3, %v842_v23 }
 0x719   :  { %v795_v24 = vpop.f32.mrb[8].mxu0 }
 0x71a   :  { %v800_v25 = vrot.slane %v795_v24, 2  ;;  %v1192_v26 = vpop.f32.mrb[9].mxu0 }
 0x71c   :  { %v802_v27 = vadd.f32 %v800_v25, %v1401_v12 }
 0x71e   :  { %1260 = vtanh.f32 %v802_v27 }
 0x728   :  { %v1261_v28 = vpop.eup %1260 }
 0x729   :  { %v805_v29 = vrot.slane %v1261_v28, 6  ;;  %v808_v30 = vmul.f32 %v1261_v28, %v1261_v28  ;;  %v931_v31 = vsel %vm927_vm6, %v930_v16, %v1261_v28  ;;  %814 = vst.msk [vmem:[#allocation2 - $0x6] sm:$0xc0] %vm813_vm7, %v1261_v28 }
 0x72b   :  { %v807_v7 = vadd.f32 %v805_v29, %v721_v18  ;;  %v810_v32 = vrot.slane %v808_v30, 6 }
 0x72d   :  { %v812_v33 = vadd.f32 %v810_v32, %v726_v19  ;;  %v816_v34 = vsel %vm815_vm8, %v807_v7, 0.0 }
 0x72e   :  { %v817_v35 = vrot.slane %v816_v34, 4 }
 0x72f   :  { %v825_v36 = vsel %vm815_vm8, %v812_v33, 0.0 }
 0x730   :  { %v818_v37 = vadd.f32 %v817_v35, %v816_v34  ;;  %v826_v38 = vrot.slane %v825_v36, 4 }
 0x732   :  { %v819_v39 = vrot.slane %v818_v37, 2  ;;  %v827_v40 = vadd.f32 %v826_v38, %v825_v36 }
 0x734   :  { %v820_v12 = vadd.f32 %v819_v39, %v818_v37  ;;  %v828_v41 = vrot.slane %v827_v40, 2 }
 0x736   :  { %v821_v42 = vrot.slane %v820_v12, 1  ;;  %v829_v43 = vadd.f32 %v828_v41, %v827_v40 }
 0x738   :  { %v822_v44 = vadd.f32 %v821_v42, %v820_v12  ;;  %v830_v45 = vrot.slane %v829_v43, 1 }
 0x73a   :  { %v824_v46 = vmul.f32 0.0625, %v822_v44  ;;  %v831_v47 = vadd.f32 %v830_v45, %v829_v43 }
 0x73c   :  { %v832_v48 = vmul.f32 0.0625, %v831_v47  ;;  %v833_v50 = vmul.f32 %v824_v46, %v824_v46 }
 0x73e   :  { %v834_v51 = vsub.f32 %v832_v48, %v833_v50 }
 0x740   :  { %v835_v52 = vmax.f32 %v834_v51, 0.0 }
 0x742   :  { %v837_v53 = vadd.f32 1e-05, %v835_v52 }
 0x744   :  { %1262 = vrsqrt.f32 %v837_v53 }
 0x74e   :  { %v1263_v58 = vpop.eup %1262 }
 0x74f   :  { %v839_v59 = vmul.f32 %v1263_v58, %v836_v56 }
 0x751   :  { %v845_v61 = vmul.f32 %v839_v59, %v824_v46  ;;  %v936_v62 = vrot.slane %v839_v59, %v935_v57 }
 0x753   :  { %v846_v63 = vsub.f32 %v844_v60, %v845_v61  ;;  %v938_v0 = vmul.f32 %v936_v62, %v1430_v49  ;;  %v939_v1 = vmul.f32 %v936_v62, %v931_v31 }
 0x755   :  { %1200 = vmatmul.mubr.msk.f32.vlgmr.msra.gmra.mrb[8].mxu1 %vm135_vm4, %v846_v63  ;;  %1208 = vmatprep.mubr.msk.f32.mxu0 %vm135_vm4, %v938_v0 }
 0x756   :  { %1209 = vmatmul.mubr.msk.f32.vlgmr.msra.gmra.mrb[10].mxu0 %vm135_vm4, %v939_v1 }
 0x757   :  { %1275 = shalt.err (!%p1272_p4)
}
 0x758   :  { %s1276_s16 = scalar_lea.hbm %s1514_s10, 32 }
 0x759   :  { %p1277_p5 = scmp.ne.s32.totalorder %s1514_s10, %s1276_s16  ;;  %p1280_p6 = scmp.lt.u32.totalorder %s1276_s16, %s1514_s10 }
 0x75b   :  { %p1282_p7 = pnand %p1280_p6, %p1277_p5 }
 0x75d   :  { %1285 = shalt.err (!%p1282_p7)
}
 0x75e   :  { %1040 = dma.vmem_to_hbm [thread:$0]  %s1038_s13, 32, %s1514_s10, [#allocation3]   ;;  %v843_v49 = vld [vmem:[%s1512_s8] sm:$0x1] }
 0x828   :  { %v919_v2 = vpop.f32.mrb[8].mxu1 }
 0x829   :  { %v923_v3 = vadd.f32 %v919_v2, %v843_v49  ;;  %v1201_v4 = vpop.f32.mrb[9].mxu1  ;;  %v1210_v5 = vpop.f32.mrb[10].mxu0 }
 0x82a   :  { %v1018_v6 = vpop.f32.mrb[11].mxu0 }
 0x82b   :  { %v944_v8 = vrot.slane %v923_v3, %v935_v57 }
 0x82d   :  { %v1024_v9 = vadd.f32 %v1210_v5, %v944_v8  ;;  %v1019_v10 = vadd.f32 %v1018_v6, %v944_v8 }
 0x82f   :  { %1028 = vst.msk [vmem:[%s1513_s9 + $0x8] sm:$0xff] %vm45_vm1, %v1024_v9  ;;  %1027 = vst.msk [vmem:[%s1513_s9] sm:$0xff] %vm45_vm1, %v1019_v10 }
 0x830   :  { %1286 = dma.done.wait [#allocation3], 32  }
 0x831   :  { %1287 = vsyncadd [#allocation3], 4294967264 }
 0x832   :  { %1046 = vsyncpa [#allocation3], 1 }

</bundles_post_ra>
